<compile_context>
chip_gen: v6e
topology: v6e:2x2x1
jax: 0.10.0
libtpu: 0.0.40
codegen_flags: <defaults>
</compile_context>

<pallas_src>
import functools

import jax
import jax.numpy as jnp
from jax import lax
from jax.experimental import pallas as pl
from jax.experimental.pallas import tpu as pltpu


def _ama_fused_kernel(x_ref, w_ref, b_ref, o_ref, slab_ref, *,
                      dilation: int, width: int, hw_valid: int):
    # x_ref:    (1, C, HWp)        one batch element; channels on sublanes,
    #                              flattened (lane-padded) H*W on lanes
    # w_ref:    (2, C, 9*C)        BN-folded weights for conv1 / conv2,
    #                              column index = (kh*3 + kw)*C + cin
    # b_ref:    (2, C, 1)          folded BN biases
    # o_ref:    (1, C, HWp)        fused output  x + r1 + r2
    # slab_ref: (C, HWp + 2*p0)    zero-extended flat slab (VMEM scratch)
    C = o_ref.shape[1]
    HWp = o_ref.shape[2]
    d, W = dilation, width
    p0 = d * W + d                   # zero extension on each side of the slab

    # Column-validity masks for the left / right kernel taps (top / bottom row
    # taps are already handled by the slab's zero extension).  In-kernel iota
    # removes the mask input stream of the previous version.
    pos = lax.broadcasted_iota(jnp.int32, (1, HWp), 1)
    col = pos % W
    lmask = (col >= d).astype(jnp.float32)
    rmask = (col < W - d).astype(jnp.float32)
    vmask = ((pos < hw_valid).astype(jnp.float32)
             if HWp != hw_valid else None)          # lane padding present?

    # The zero pads of the slab are never dirtied below; zero the slab once.
    slab_ref[...] = jnp.zeros(slab_ref.shape, jnp.float32)

    def conv_bn_relu(x, w, b):
        # x: (C, HWp) f32,  w: (C, 9C) f32,  b: (C, 1) f32
        if vmask is not None:
            x = x * vmask            # keep the lane padding at exactly zero
        slab_ref[:, p0:p0 + HWp] = x
        taps = []
        for kh in range(3):
            for kw in range(3):
                s = p0 + (kh - 1) * d * W + (kw - 1) * d     # static, >= 0
                t = slab_ref[:, s:s + HWp]
                if kw == 0:
                    t = t * lmask
                elif kw == 2:
                    t = t * rmask
                taps.append(t)
        # Stack the 9 taps along the contraction axis -> single MXU matmul.
        # TODO(synk): for large C / HW, chunk HWp inside a fori_loop to bound
        # vreg pressure; unnecessary at AMA's sizes.
        rhs = jnp.concatenate(taps, axis=0)                  # (9C, HWp)
        y = jnp.dot(w, rhs, preferred_element_type=jnp.float32)
        return jnp.maximum(y + b, 0.0)                       # BN bias + ReLU

    x0 = x_ref[0].astype(jnp.float32)                        # (C, HWp)
    x1 = x0 + conv_bn_relu(x0, w_ref[0], b_ref[0])           # x + ConvBNR1(x)
    x2 = x1 + conv_bn_relu(x1, w_ref[1], b_ref[1])           # + ConvBNR2(...)
    o_ref[0] = x2.astype(o_ref.dtype)


def _vreg_padded_bytes(shape, dtype):
    """Bytes of a VMEM-resident block, last two dims rounded to (8, 128)."""
    s = list(shape)
    s[-1] = -(-s[-1] // 128) * 128
    if len(s) >= 2:
        s[-2] = -(-s[-2] // 8) * 8
    n = 1
    for v in s:
        n *= int(v)
    return n * jnp.dtype(dtype).itemsize


def ama_forward(x_nchw, params1, params2, *, dilation=1, eps=1e-5):
    """AMA.forward: x = x + ConvBNR1(x); x = x + ConvBNR2(x).  NCHW in/out."""
    N, C, H, W = x_nchw.shape
    d = int(dilation)
    assert 1 <= d < W and d < H
    # TODO(synk): stride > 1 is not used by AMA and is not implemented here.

    hw = H * W
    hw_pad = -(-hw // 128) * 128          # lane-dense (multiple-of-128) width
    p0 = d * W + d
    dt = x_nchw.dtype

    def fold(p):
        # Fold eval-mode BatchNorm into the conv:
        #   w <- w * scale[cout],  b <- beta - mean * scale
        w, gamma, beta, mean, var = p
        assert w.shape == (C, C, 3, 3), "AMA ConvBNR is 3x3, C -> C"
        scale = gamma / jnp.sqrt(var + eps)
        bias = (beta - mean * scale).astype(jnp.float32)
        # (Cout, Cin, KH, KW) -> (Cout, KH, KW, Cin) -> (Cout, 9*Cin)
        wm = (jnp.transpose(w, (0, 2, 3, 1)).astype(jnp.float32)
              * scale[:, None, None, None]).reshape(C, 9 * C)
        return wm, bias

    w1, b1 = fold(params1)
    w2, b2 = fold(params2)
    w_all = jnp.stack([w1, w2])                       # (2, C, 9C) f32
    b_all = jnp.stack([b1, b2]).reshape(2, C, 1)      # (2, C, 1)  f32

    # Free, contiguous reshape; keep the caller's dtype in HBM.
    x_flat = x_nchw.reshape(N, C, hw)
    if hw_pad != hw:
        x_flat = jnp.pad(x_flat, ((0, 0), (0, 0), (0, hw_pad - hw)))

    kernel = functools.partial(_ama_fused_kernel,
                               dilation=d, width=W, hw_valid=hw)

    # VMEM budget from the actual block sizes (double-buffered pipeline blocks
    # + scratch), with headroom — not a hard-coded constant.
    need = (2 * _vreg_padded_bytes((1, C, hw_pad), dt)            # x block
            + 2 * _vreg_padded_bytes((1, C, hw_pad), dt)          # out block
            + 2 * _vreg_padded_bytes((2, C, 9 * C), jnp.float32)  # weights
            + 2 * _vreg_padded_bytes((2, C, 1), jnp.float32)      # biases
            + _vreg_padded_bytes((C, hw_pad + 2 * p0), jnp.float32))
    vmem_limit = int(min(100 * 1024 * 1024, max(16 * 1024 * 1024, 2 * need)))

    out_flat = pl.pallas_call(
        kernel,
        out_shape=jax.ShapeDtypeStruct((N, C, hw_pad), dt),
        grid_spec=pltpu.PrefetchScalarGridSpec(
            num_scalar_prefetch=0,
            grid=(N,),
            in_specs=[
                pl.BlockSpec((1, C, hw_pad), lambda n: (n, 0, 0)),
                pl.BlockSpec((2, C, 9 * C), lambda n: (0, 0, 0)),
                pl.BlockSpec((2, C, 1), lambda n: (0, 0, 0)),
            ],
            out_specs=pl.BlockSpec((1, C, hw_pad), lambda n: (n, 0, 0)),
            scratch_shapes=[pltpu.VMEM((C, hw_pad + 2 * p0), jnp.float32)],
        ),
        compiler_params=pltpu.CompilerParams(
            dimension_semantics=("parallel",),
            vmem_limit_bytes=vmem_limit),
    )(x_flat, w_all, b_all)

    out = out_flat[:, :, :hw] if hw_pad != hw else out_flat
    return out.reshape(N, C, H, W)


# ----------------------------- reference (plain JAX) -------------------------

def _ref_convbnr(x, w, gamma, beta, mean, var, *, dilation=1, eps=1e-5):
    y = lax.conv_general_dilated(
        x, w, window_strides=(1, 1),
        padding=((dilation, dilation), (dilation, dilation)),
        rhs_dilation=(dilation, dilation),
        dimension_numbers=("NCHW", "OIHW", "NCHW"))
    scale = gamma / jnp.sqrt(var + eps)
    bias = beta - mean * scale
    return jnp.maximum(y * scale[None, :, None, None]
                       + bias[None, :, None, None], 0.0)


def _ref_ama(x, params1, params2):
    x = x + _ref_convbnr(x, *params1)
    x = x + _ref_convbnr(x, *params2)
    return x


if __name__ == "__main__":
    # AMA(channel=4) on a (2, 4, 16, 16) NCHW input.
    N, C, H, W = 2, 4, 16, 16

    key = jax.random.PRNGKey(0)
    keys = jax.random.split(key, 11)
    x = jax.random.normal(keys[0], (N, C, H, W), jnp.float32)

    def make_params(ks):
        w = 0.1 * jax.random.normal(ks[0], (C, C, 3, 3), jnp.float32)
        gamma = 1.0 + 0.1 * jax.random.normal(ks[1], (C,), jnp.float32)
        beta = 0.1 * jax.random.normal(ks[2], (C,), jnp.float32)
        mean = 0.1 * jax.random.normal(ks[3], (C,), jnp.float32)
        var = 1.0 + 0.1 * jax.random.uniform(ks[4], (C,), jnp.float32)
        return (w, gamma, beta, mean, var)

    p1 = make_params(keys[1:6])
    p2 = make_params(keys[6:11])

    out = ama_forward(x, p1, p2)
    out = jax.block_until_ready(out)

    ref = _ref_ama(x, p1, p2)
    assert out.shape == (N, C, H, W), out.shape
    err = float(jnp.max(jnp.abs(out - ref)))
    assert jnp.allclose(out, ref, atol=1e-3, rtol=1e-3), f"mismatch, max err {err}"

    print("KERNEL_OK")
</pallas_src>

<mosaic_0001>
module attributes {stable_mosaic.version = 11 : i64} {
  func.func @_ama_fused_kernel(%arg0: i32, %arg1: memref<1x4x256xf32, #tpu.memory_space<vmem>>, %arg2: memref<2x4x36xf32, #tpu.memory_space<vmem>>, %arg3: memref<2x4x1xf32, #tpu.memory_space<vmem>>, %arg4: memref<1x4x256xf32, #tpu.memory_space<vmem>>, %arg5: memref<4x290xf32, #tpu.memory_space<vmem>>) attributes {dimension_semantics = [#tpu.dimension_semantics<parallel>], iteration_bounds = array<i64: 2>, scalar_prefetch = 0 : i64, scratch_operands = 1 : i64, tpu.core_type = #tpu.core_type<tc>, window_params = [{transform_indices = @transform_0, window_bounds = array<i64: 1, 4, 256>}, {pipeline_mode = #tpu.pipeline_mode<synchronous>, transform_indices = @transform_1, window_bounds = array<i64: 2, 4, 36>}, {pipeline_mode = #tpu.pipeline_mode<synchronous>, transform_indices = @transform_2, window_bounds = array<i64: 2, 4, 1>}, {transform_indices = @transform_3, window_bounds = array<i64: 1, 4, 256>}]} {
    %0 = tpu.iota {dimensions = array<i32: 1>} : vector<1x256xi32>
    %c16_i32 = arith.constant 16 : i32
    %c0_i32 = arith.constant 0 : i32
    %1 = arith.cmpi eq, %c16_i32, %c0_i32 : i32
    %c1_i32 = arith.constant 1 : i32
    %2 = arith.select %1, %c1_i32, %c16_i32 : i32
    %3 = vector.broadcast %2 : i32 to vector<1x256xi32>
    %4 = arith.remsi %0, %3 : vector<1x256xi32>
    %c0_i32_0 = arith.constant 0 : i32
    %5 = vector.broadcast %c0_i32_0 : i32 to vector<1x256xi32>
    %6 = arith.cmpi ne, %4, %5 : vector<1x256xi32>
    %c0_i32_1 = arith.constant 0 : i32
    %7 = vector.broadcast %c0_i32_1 : i32 to vector<1x256xi32>
    %8 = arith.cmpi slt, %4, %7 : vector<1x256xi32>
    %c0_i32_2 = arith.constant 0 : i32
    %9 = arith.cmpi slt, %2, %c0_i32_2 : i32
    %10 = vector.broadcast %9 : i1 to vector<1x256xi1>
    %11 = vector.broadcast %10 : vector<1x256xi1> to vector<1x256xi1>
    %12 = arith.xori %8, %11 : vector<1x256xi1>
    %13 = arith.andi %12, %6 : vector<1x256xi1>
    %14 = vector.broadcast %2 : i32 to vector<1x256xi32>
    %15 = arith.addi %4, %14 : vector<1x256xi32>
    %16 = arith.select %13, %15, %4 : vector<1x256xi1>, vector<1x256xi32>
    %c1_i32_3 = arith.constant 1 : i32
    %17 = vector.broadcast %c1_i32_3 : i32 to vector<1x256xi32>
    %18 = arith.cmpi sge, %16, %17 : vector<1x256xi32>
    %19 = arith.extui %18 : vector<1x256xi1> to vector<1x256xi32>
    %20 = arith.sitofp %19 : vector<1x256xi32> to vector<1x256xf32>
    %c15_i32 = arith.constant 15 : i32
    %21 = vector.broadcast %c15_i32 : i32 to vector<1x256xi32>
    %22 = arith.cmpi slt, %16, %21 : vector<1x256xi32>
    %23 = arith.extui %22 : vector<1x256xi1> to vector<1x256xi32>
    %24 = arith.sitofp %23 : vector<1x256xi32> to vector<1x256xf32>
    %cst = arith.constant 0.000000e+00 : f32
    %25 = vector.broadcast %cst : f32 to vector<4x290xf32>
    %c0 = arith.constant 0 : index
    %c0_4 = arith.constant 0 : index
    %26 = vector.load %arg5[%c0, %c0_4] : memref<4x290xf32, #tpu.memory_space<vmem>>, vector<4x290xf32>
    tpu.vector_store %arg5[%c0, %c0_4], %25 {strides = array<i32>} : memref<4x290xf32, #tpu.memory_space<vmem>>, vector<4x290xf32>,
    %c0_5 = arith.constant 0 : index
    %c0_6 = arith.constant 0 : index
    %c0_7 = arith.constant 0 : index
    %27 = vector.load %arg1[%c0_5, %c0_6, %c0_7] : memref<1x4x256xf32, #tpu.memory_space<vmem>>, vector<1x4x256xf32>
    %28 = vector.shape_cast %27 : vector<1x4x256xf32> to vector<4x256xf32>
    %c0_8 = arith.constant 0 : index
    %c0_9 = arith.constant 0 : index
    %c0_10 = arith.constant 0 : index
    %29 = vector.load %arg2[%c0_8, %c0_9, %c0_10] : memref<2x4x36xf32, #tpu.memory_space<vmem>>, vector<1x4x36xf32>
    %30 = vector.shape_cast %29 : vector<1x4x36xf32> to vector<4x36xf32>
    %c0_11 = arith.constant 0 : index
    %c0_12 = arith.constant 0 : index
    %c0_13 = arith.constant 0 : index
    %31 = vector.load %arg3[%c0_11, %c0_12, %c0_13] : memref<2x4x1xf32, #tpu.memory_space<vmem>>, vector<1x4x1xf32>
    %32 = vector.shape_cast %31 : vector<1x4x1xf32> to vector<4x1xf32>
    %c0_14 = arith.constant 0 : index
    %c17 = arith.constant 17 : index
    %33 = vector.load %arg5[%c0_14, %c17] : memref<4x290xf32, #tpu.memory_space<vmem>>, vector<4x256xf32>
    tpu.vector_store %arg5[%c0_14, %c17], %28 {strides = array<i32>} : memref<4x290xf32, #tpu.memory_space<vmem>>, vector<4x256xf32>,
    %c0_15 = arith.constant 0 : index
    %c0_16 = arith.constant 0 : index
    %34 = vector.load %arg5[%c0_15, %c0_16] : memref<4x290xf32, #tpu.memory_space<vmem>>, vector<4x256xf32>
    %35 = vector.broadcast %20 : vector<1x256xf32> to vector<4x256xf32>
    %36 = arith.mulf %34, %35 : vector<4x256xf32>
    %c0_17 = arith.constant 0 : index
    %c1 = arith.constant 1 : index
    %37 = vector.load %arg5[%c0_17, %c1] : memref<4x290xf32, #tpu.memory_space<vmem>>, vector<4x256xf32>
    %c0_18 = arith.constant 0 : index
    %c2 = arith.constant 2 : index
    %38 = vector.load %arg5[%c0_18, %c2] : memref<4x290xf32, #tpu.memory_space<vmem>>, vector<4x256xf32>
    %39 = vector.broadcast %24 : vector<1x256xf32> to vector<4x256xf32>
    %40 = arith.mulf %38, %39 : vector<4x256xf32>
    %c0_19 = arith.constant 0 : index
    %c16 = arith.constant 16 : index
    %41 = vector.load %arg5[%c0_19, %c16] : memref<4x290xf32, #tpu.memory_space<vmem>>, vector<4x256xf32>
    %42 = vector.broadcast %20 : vector<1x256xf32> to vector<4x256xf32>
    %43 = arith.mulf %41, %42 : vector<4x256xf32>
    %c0_20 = arith.constant 0 : index
    %c17_21 = arith.constant 17 : index
    %44 = vector.load %arg5[%c0_20, %c17_21] : memref<4x290xf32, #tpu.memory_space<vmem>>, vector<4x256xf32>
    %c0_22 = arith.constant 0 : index
    %c18 = arith.constant 18 : index
    %45 = vector.load %arg5[%c0_22, %c18] : memref<4x290xf32, #tpu.memory_space<vmem>>, vector<4x256xf32>
    %46 = vector.broadcast %24 : vector<1x256xf32> to vector<4x256xf32>
    %47 = arith.mulf %45, %46 : vector<4x256xf32>
    %c0_23 = arith.constant 0 : index
    %c32 = arith.constant 32 : index
    %48 = vector.load %arg5[%c0_23, %c32] : memref<4x290xf32, #tpu.memory_space<vmem>>, vector<4x256xf32>
    %49 = vector.broadcast %20 : vector<1x256xf32> to vector<4x256xf32>
    %50 = arith.mulf %48, %49 : vector<4x256xf32>
    %c0_24 = arith.constant 0 : index
    %c33 = arith.constant 33 : index
    %51 = vector.load %arg5[%c0_24, %c33] : memref<4x290xf32, #tpu.memory_space<vmem>>, vector<4x256xf32>
    %c0_25 = arith.constant 0 : index
    %c34 = arith.constant 34 : index
    %52 = vector.load %arg5[%c0_25, %c34] : memref<4x290xf32, #tpu.memory_space<vmem>>, vector<4x256xf32>
    %53 = vector.broadcast %24 : vector<1x256xf32> to vector<4x256xf32>
    %54 = arith.mulf %52, %53 : vector<4x256xf32>
    %55 = tpu.concatenate %36, %37, %40, %43, %44, %47, %50, %51, %54 in 0 : vector<4x256xf32>, vector<4x256xf32>, vector<4x256xf32>, vector<4x256xf32>, vector<4x256xf32>, vector<4x256xf32>, vector<4x256xf32>, vector<4x256xf32>, vector<4x256xf32> -> vector<36x256xf32>
    %cst_26 = arith.constant dense<0.000000e+00> : vector<4x256xf32>
    %56 = tpu.matmul %30, %55, %cst_26 {dimension_numbers = #tpu.dot_dimension_numbers<[1], [0], [0], [1], [0, 0, 1, 1], [], []>} : vector<4x36xf32>, vector<36x256xf32>, vector<4x256xf32> -> vector<4x256xf32>
    %57 = vector.broadcast %32 : vector<4x1xf32> to vector<4x256xf32>
    %58 = arith.addf %56, %57 : vector<4x256xf32>
    %cst_27 = arith.constant 0.000000e+00 : f32
    %59 = vector.broadcast %cst_27 : f32 to vector<4x256xf32>
    %60 = arith.maximumf %58, %59 : vector<4x256xf32>
    %61 = arith.addf %28, %60 : vector<4x256xf32>
    %c1_28 = arith.constant 1 : index
    %c0_29 = arith.constant 0 : index
    %c0_30 = arith.constant 0 : index
    %62 = vector.load %arg2[%c1_28, %c0_29, %c0_30] : memref<2x4x36xf32, #tpu.memory_space<vmem>>, vector<1x4x36xf32>
    %63 = vector.shape_cast %62 : vector<1x4x36xf32> to vector<4x36xf32>
    %c1_31 = arith.constant 1 : index
    %c0_32 = arith.constant 0 : index
    %c0_33 = arith.constant 0 : index
    %64 = vector.load %arg3[%c1_31, %c0_32, %c0_33] : memref<2x4x1xf32, #tpu.memory_space<vmem>>, vector<1x4x1xf32>
    %65 = vector.shape_cast %64 : vector<1x4x1xf32> to vector<4x1xf32>
    %c0_34 = arith.constant 0 : index
    %c17_35 = arith.constant 17 : index
    %66 = vector.load %arg5[%c0_34, %c17_35] : memref<4x290xf32, #tpu.memory_space<vmem>>, vector<4x256xf32>
    tpu.vector_store %arg5[%c0_34, %c17_35], %61 {strides = array<i32>} : memref<4x290xf32, #tpu.memory_space<vmem>>, vector<4x256xf32>,
    %c0_36 = arith.constant 0 : index
    %c0_37 = arith.constant 0 : index
    %67 = vector.load %arg5[%c0_36, %c0_37] : memref<4x290xf32, #tpu.memory_space<vmem>>, vector<4x256xf32>
    %68 = vector.broadcast %20 : vector<1x256xf32> to vector<4x256xf32>
    %69 = arith.mulf %67, %68 : vector<4x256xf32>
    %c0_38 = arith.constant 0 : index
    %c1_39 = arith.constant 1 : index
    %70 = vector.load %arg5[%c0_38, %c1_39] : memref<4x290xf32, #tpu.memory_space<vmem>>, vector<4x256xf32>
    %c0_40 = arith.constant 0 : index
    %c2_41 = arith.constant 2 : index
    %71 = vector.load %arg5[%c0_40, %c2_41] : memref<4x290xf32, #tpu.memory_space<vmem>>, vector<4x256xf32>
    %72 = vector.broadcast %24 : vector<1x256xf32> to vector<4x256xf32>
    %73 = arith.mulf %71, %72 : vector<4x256xf32>
    %c0_42 = arith.constant 0 : index
    %c16_43 = arith.constant 16 : index
    %74 = vector.load %arg5[%c0_42, %c16_43] : memref<4x290xf32, #tpu.memory_space<vmem>>, vector<4x256xf32>
    %75 = vector.broadcast %20 : vector<1x256xf32> to vector<4x256xf32>
    %76 = arith.mulf %74, %75 : vector<4x256xf32>
    %c0_44 = arith.constant 0 : index
    %c17_45 = arith.constant 17 : index
    %77 = vector.load %arg5[%c0_44, %c17_45] : memref<4x290xf32, #tpu.memory_space<vmem>>, vector<4x256xf32>
    %c0_46 = arith.constant 0 : index
    %c18_47 = arith.constant 18 : index
    %78 = vector.load %arg5[%c0_46, %c18_47] : memref<4x290xf32, #tpu.memory_space<vmem>>, vector<4x256xf32>
    %79 = vector.broadcast %24 : vector<1x256xf32> to vector<4x256xf32>
    %80 = arith.mulf %78, %79 : vector<4x256xf32>
    %c0_48 = arith.constant 0 : index
    %c32_49 = arith.constant 32 : index
    %81 = vector.load %arg5[%c0_48, %c32_49] : memref<4x290xf32, #tpu.memory_space<vmem>>, vector<4x256xf32>
    %82 = vector.broadcast %20 : vector<1x256xf32> to vector<4x256xf32>
    %83 = arith.mulf %81, %82 : vector<4x256xf32>
    %c0_50 = arith.constant 0 : index
    %c33_51 = arith.constant 33 : index
    %84 = vector.load %arg5[%c0_50, %c33_51] : memref<4x290xf32, #tpu.memory_space<vmem>>, vector<4x256xf32>
    %c0_52 = arith.constant 0 : index
    %c34_53 = arith.constant 34 : index
    %85 = vector.load %arg5[%c0_52, %c34_53] : memref<4x290xf32, #tpu.memory_space<vmem>>, vector<4x256xf32>
    %86 = vector.broadcast %24 : vector<1x256xf32> to vector<4x256xf32>
    %87 = arith.mulf %85, %86 : vector<4x256xf32>
    %88 = tpu.concatenate %69, %70, %73, %76, %77, %80, %83, %84, %87 in 0 : vector<4x256xf32>, vector<4x256xf32>, vector<4x256xf32>, vector<4x256xf32>, vector<4x256xf32>, vector<4x256xf32>, vector<4x256xf32>, vector<4x256xf32>, vector<4x256xf32> -> vector<36x256xf32>
    %cst_54 = arith.constant dense<0.000000e+00> : vector<4x256xf32>
    %89 = tpu.matmul %63, %88, %cst_54 {dimension_numbers = #tpu.dot_dimension_numbers<[1], [0], [0], [1], [0, 0, 1, 1], [], []>} : vector<4x36xf32>, vector<36x256xf32>, vector<4x256xf32> -> vector<4x256xf32>
    %90 = vector.broadcast %65 : vector<4x1xf32> to vector<4x256xf32>
    %91 = arith.addf %89, %90 : vector<4x256xf32>
    %cst_55 = arith.constant 0.000000e+00 : f32
    %92 = vector.broadcast %cst_55 : f32 to vector<4x256xf32>
    %93 = arith.maximumf %91, %92 : vector<4x256xf32>
    %94 = arith.addf %61, %93 : vector<4x256xf32>
    %c0_56 = arith.constant 0 : index
    %c0_57 = arith.constant 0 : index
    %c0_58 = arith.constant 0 : index
    %95 = vector.load %arg4[%c0_56, %c0_57, %c0_58] : memref<1x4x256xf32, #tpu.memory_space<vmem>>, vector<1x4x256xf32>
    %96 = vector.shape_cast %95 : vector<1x4x256xf32> to vector<4x256xf32>
    %97 = vector.shape_cast %94 : vector<4x256xf32> to vector<1x4x256xf32>
    tpu.vector_store %arg4[%c0_56, %c0_57, %c0_58], %97 {strides = array<i32>} : memref<1x4x256xf32, #tpu.memory_space<vmem>>, vector<1x4x256xf32>,
    return
  }
  func.func @transform_0(%arg0: i32) -> (i32, i32, i32) {
    %c0_i32 = arith.constant 0 : i32
    %c0_i32_0 = arith.constant 0 : i32
    %c0_i32_1 = arith.constant 0 : i32
    return %arg0, %c0_i32, %c0_i32_0 : i32, i32, i32
  }
  func.func @transform_1(%arg0: i32) -> (i32, i32, i32) {
    %c0_i32 = arith.constant 0 : i32
    %c0_i32_0 = arith.constant 0 : i32
    %c0_i32_1 = arith.constant 0 : i32
    %c0_i32_2 = arith.constant 0 : i32
    return %c0_i32, %c0_i32_0, %c0_i32_1 : i32, i32, i32
  }
  func.func @transform_2(%arg0: i32) -> (i32, i32, i32) {
    %c0_i32 = arith.constant 0 : i32
    %c0_i32_0 = arith.constant 0 : i32
    %c0_i32_1 = arith.constant 0 : i32
    %c0_i32_2 = arith.constant 0 : i32
    return %c0_i32, %c0_i32_0, %c0_i32_1 : i32, i32, i32
  }
  func.func @transform_3(%arg0: i32) -> (i32, i32, i32) {
    %c0_i32 = arith.constant 0 : i32
    %c0_i32_0 = arith.constant 0 : i32
    %c0_i32_1 = arith.constant 0 : i32
    return %arg0, %c0_i32, %c0_i32_0 : i32, i32, i32
  }
}

</mosaic_0001>

<bundles_post_ra>
// kernel: tpu_custom_call.1
= control target key start
LH: loop header
LB: loop body
LE: loop exit
PB: predicated region body
PF: predicated region fallthrough
CT: control target
= control target key end

     0   :  { %8 = vsyncpa [#allocation4], 0  ;;  %s1417_s0 = inlined_call_operand.hbm [shape: f32[2,4,256], index: 0, kind: input, shape index: {}]   ;;  %s1418_s1 = inlined_call_operand.vmem [shape: f32[2,4,36], index: 1, kind: input, shape index: {}]   ;;  %s1419_s2 = inlined_call_operand.vmem [shape: f32[2,4,1], index: 2, kind: input, shape index: {}]   ;;  %s1420_s3 = inlined_call_operand.hbm [shape: f32[2,4,256], index: 3, kind: output, shape index: {}]  }
   0x1   :  { %10 = vsyncpa [#allocation4 + $0x1], 0 }
   0x2   :  { %11 = vsyncpa [#allocation5], 0 }
   0x3   :  { %13 = vsyncpa [#allocation5 + $0x1], 0  ;;  %s1055_s12 = smov 0   ;;  %s1057_s13 = smov 0  }
   0x4   :  { %s1059_s14 = smov 0   ;;  %s1061_s15 = smov 0  }
   0x5 LB: > { %s1076_s16 = sadd.s32 4294967295, %s1015_s15   ;;  %s825_s17 = sadd.s32 4294967294, %s1015_s15   ;;  %s1015_s15 = sphi %s1061_s15, %s1439_s15   ;;  %s1011_s14 = sphi %s1059_s14, %s1438_s14   ;;  %s1007_s13 = sphi %s1057_s13, %s1437_s13   ;;  %s1003_s12 = sphi %s1055_s12, %s1436_s12  }
   0x6   : > { %s1080_s18 = sadd.s32 1, %s1015_s15   ;;  %s26_s19 = sadd.s32 1, %s1011_s14 }
   0x7   : > { %s23_s20 = ssub.s32 %s1015_s15, %s1080_s18  ;;  %p33_p0 = scmp.ne.s32.totalorder %s1011_s14, %s1007_s13 }
   0x8   : > { %p24_p1 = scmp.eq.s32.totalorder %s23_s20, 0  ;;  %p34_p2 = scmp.eq.s32.totalorder %s1015_s15, 0 }
   0x9   : > { %p39_p3 = scmp.ne.s32.totalorder %s1007_s13, %s1003_s12  ;;  %p40_p4 = scmp.eq.s32.totalorder %s1076_s16, 0 }
   0xa   : > { %s1092_s21 = scalar_select %p24_p1, %s1011_s14, %s26_s19  }
   0xb   : > { %p1094_p5 = por %p34_p2, %p33_p0  ;;  %p1098_p6 = por %p40_p4, %p39_p3 }
   0xc   : > { %p105_p7 = scmp.eq.s32.totalorder %s1076_s16, 1  ;;  %p111_p8 = scmp.eq.s32.totalorder %s825_s17, 1 }
   0xd   : > { %s1424_s23 = scalar_select %p1098_p6, 1, 0 }
   0xe   : > { %p865_p10 = scmp.lt.s32.totalorder %s1015_s15, 2  ;;  %p1105_p11 = por %p105_p7, %p33_p0 }
   0xf   : > { %p1109_p12 = por %p111_p8, %p39_p3  ;;  %s137_s26 = sand.u32 1, %s1011_s14  }
  0x10   : > { %s1425_s24 = scalar_select %p1105_p11, 1, 0 }
  0x11   : > { %s1426_s25 = scalar_select %p1109_p12, 1, 0 }
  0x12   : > { %s851_s27 = sshll.u32 %s1015_s15, 7  ;;  %s828_s28 = sshll.u32 %s137_s26, 3 }
  0x13   : > { %s1118_s4 = scalar_lea.hbm %s1417_s0, %s851_s27  ;;  %s141_s5 = scalar_lea.vmem [#allocation3], %s828_s28 }
  0x14   : > { %s149_s6 = sshll.u32 %s141_s5, 4  ;;  %p1122_p13 = pnand %p865_p10, %p1094_p5  ;;  %s1126_s6 = int_to_ptr.vmem [resolvable:$true] %s149_s6 }
  0x15   : > { %s138_s8 = scalar_lea.sflag [#allocation4], %s137_s26  ;;  %s923_s9 = scalar_lea.hbm %s1118_s4, 128 }
  0x16   : > { %p924_p2 = scmp.ne.s32.totalorder %s1118_s4, %s923_s9  ;;  %p925_p3 = pneg %p1122_p13 }
  0x17   : > { %s928_s17 = scalar_lea.hbm %s1417_s0, 256  ;;  %p929_p5 = scmp.lt.s32.totalorder %s1118_s4, %s1417_s0 }
  0x18   : > { %p926_p4 = pnand %p925_p3, %p924_p2  ;;  %p930_p8 = scmp.lt.s32.totalorder %s928_s17, %s923_s9 }
  0x1a   : > { %p927_p7 = pneg %p926_p4  ;;  %p931_p10 = por %p930_p8, %p929_p5 }
  0x1c   : > { %p932_p9 = pnand %p931_p10, %p927_p7 }
  0x1e   : > { %935 = shalt.err (!%p932_p9)
}
  0x1f   : > { %s936_s22 = scalar_lea.vmem %s1126_s6, 128  ;;  %s1017_s26 = smov [#allocation3]  }
  0x20   : > { %p937_p0 = scmp.ne.s32.totalorder %s1126_s6, %s936_s22  ;;  %s941_s27 = sshll.u32 %s1017_s26, 4  ;;  %s942_s27 = int_to_ptr.vmem [resolvable:$false] %s941_s27 }
  0x21   : > { %s943_s28 = scalar_lea.vmem %s942_s27, 256  ;;  %p944_p4 = scmp.lt.s32.totalorder %s1126_s6, %s942_s27 }
  0x22   : > { %p939_p1 = pnand %p937_p0, %p925_p3  ;;  %p945_p12 = scmp.lt.s32.totalorder %s943_s28, %s936_s22 }
  0x24   : > { %p940_p2 = pneg %p939_p1  ;;  %p946_p11 = por %p945_p12, %p944_p4 }
  0x26   : > { %p947_p6 = pnand %p946_p11, %p940_p2 }
  0x28   : > { %950 = shalt.err (!%p947_p6)
}
  0x29   : > { %860 = dma.hbm_to_vmem [thread:$0]  (!%p1122_p13), %s1118_s4, 128, %s1126_s6, %s138_s8  }
  0x2a   : > { %p1428_p9 = scmp.lt.s32.totalorder %s1015_s15, 3  ;;  %p1429_p7 = scmp.ge.s32.totalorder %s1015_s15, 1 }
  0x2c   : > { %p155_p0 = pnand %p1429_p7, %p1428_p9 }
  0x2d   : > { %s1153_s29 = sand.u32 (!%p155_p0), 1, %s1007_s13   ;;  %p1430_p6 = scmp.ne.s32.totalorder (!%p155_p0), %s1424_s23, 0 }
  0x2e   : > { %158 = sbr.rel (%p155_p0) target bundleno = 1049 (0x419), region = 32  ;;  %s832_s30 = sshll.u32 (!%p155_p0), %s1153_s29, 3 }
  0x2f   : > { %s161_s5 = scalar_lea.sflag (!%p155_p0), [#allocation4], %s1153_s29  ;;  %s164_s7 = scalar_lea.vmem (!%p155_p0), [#allocation3], %s832_s30 }
  0x33   : > { %994 = dma.done.wait (%p1430_p6), %s161_s5, 128  }
  0x34   : > { %996 = vsyncadd (%p1430_p6), %s161_s5, 4294967168  ;;  %v187_v0 = vlaneseq  ;;  %vm227_vm0 = vcmask 273408   ;;  %v1018_v1 = vmov 0.0   ;;  %v1163_v6 = vld [vmem:[%s164_s7] sm:$0xff]  ;;  %s1019_s4 = smov 17   ;;  %s1020_s23 = smov 32  }
  0x35   : > { %226 = vst [vmem:[#allocation2] sm:$0xff] %v1018_v1  ;;  %228 = vst.msk [vmem:[#allocation2 + $0x8] sm:$0xf] %vm227_vm0, %v1018_v1  ;;  %498 = vmatprep.mubr.f32.mxu0 %v1018_v1  ;;  %725 = vmatprep.mubr.f32.mxu1 %v1018_v1  ;;  %s1021_s6 = smov 34   ;;  %s1022_s8 = smov 18   ;;  %vm240_vm5 = vcmask 1043592  }
  0x36   : > { %v188_v2 = vand.u32 127, %v187_v0  ;;  %233 = vrot.lane.b32.xlu0 %v1163_v6, %s1019_s4  ;;  %s1023_s9 = smov 2   ;;  %s1024_s10 = smov 16   ;;  %vm241_vm6 = vcmask 1047556   ;;  %vm236_vm7 = vcmask 138240   ;;  %vm244_vm8 = vcmask 134144  }
  0x37   : > { %vm1171_vm9 = vmor %vm241_vm6, %vm240_vm5  ;;  %s1025_s11 = smov 111   ;;  %vm295_vm10 = vcmask 277504   ;;  %s1026_s17 = smov 95   ;;  %vm286_vm11 = vcmask 261120   ;;  %vm277_vm12 = vcmask 146432   ;;  %vm268_vm13 = vcmask 130048  }
  0x38   : > { %v189_v3 = vadd.s32 128, %v188_v2  ;;  %v194_v4 = vand.u32 15, %v188_v2  ;;  %s1027_s19 = smov 127   ;;  %s1028_s20 = smov 126   ;;  %vm259_vm14 = vcmask 15360   ;;  %v1033_v52 = vmov 0  }
  0x39   : > { %s1029_s22 = smov 94   ;;  %s1030_s26 = smov 96   ;;  %916 = vset.pattern.permute.xlu1 %v1033_v52  ;;  %915 = vset.pattern.permute.xlu0 %v1033_v52  ;;  %v231_v55 = vld [vmem:[%s1419_s2] sm:$0xf]  ;;  %vm409_vm15 = vcmask 769024   ;;  %vm412_vm0 = vcmask 1043456  }
  0x3a   : > { %v201_v5 = vand.u32 15, %v189_v3  ;;  %vm214_vm1 = vcmp.ge.s32.totalorder %v194_v4, 1  ;;  %vm220_vm2 = vcmp.lt.s32.totalorder %v194_v4, 15  ;;  %s1031_s27 = smov 110   ;;  %s1032_s28 = smov 112   ;;  %vm343_vm5 = vcmask 916480  }
  0x3b   : > { %v834_v7 = vsel %vm214_vm1, 1.0, %v1018_v1  ;;  %v836_v8 = vsel %vm220_vm2, 1.0, %v1018_v1  ;;  %vm395_vm1 = vcmask 777216   ;;  %vm370_vm2 = vcmask 900096   ;;  %p1433_p12 = scmp.ne.s32.totalorder %s1425_s24, 0  ;;  %s1034_s5 = smov [#allocation6]  }
  0x3c   : > { %vm215_vm3 = vcmp.ge.s32.totalorder %v201_v5, 1  ;;  %vm221_vm4 = vcmp.lt.s32.totalorder %v201_v5, 15  ;;  %vm328_vm6 = vcmask 1031168  }
  0x3d   : > { %v835_v9 = vsel %vm215_vm3, 1.0, %v1018_v1  ;;  %v837_v10 = vsel %vm221_vm4, 1.0, %v1018_v1  ;;  %vm384_vm3 = vcmask 785408   ;;  %vm355_vm4 = vcmask 908288  }
  0x3e   : > { %v1167_v11 = vcombine.low %v834_v7, %v835_v9  ;;  %v255_v12 = vcombine.low %v836_v8, %v837_v10 }
  0x40   : > { %283 = vrot.lane.b32.xlu1 %v1167_v11, %s1020_s23  ;;  %292 = vrot.lane.b32.xlu0 %v255_v12, %s1021_s6 }
  0x44   : > { %274 = vrot.lane.b32.xlu1 %v255_v12, %s1022_s8  ;;  %256 = vrot.lane.b32.xlu0 %v255_v12, %s1023_s9 }
  0x48   : > { %265 = vrot.lane.b32.xlu1 %v1167_v11, %s1024_s10 }
  0xa8   : > { %v234_v13 = vpop.permute.xlu0 %233 }
  0xa9   : > { %v235_v15 = vrot.slane %v234_v13, 4 }
  0xab   : > { %v237_v16 = vsel %vm236_vm7, %v235_v15, %v234_v13  ;;  %245 = vst.msk [vmem:[#allocation2 + $0x8] sm:$0xf] %vm244_vm8, %v235_v15 }
  0xac   : > { %243 = vst.msk [vmem:[#allocation2] sm:$0xff] %vm1171_vm9, %v237_v16 }
  0xb2   : > { %v293_v17 = vpop.permute.xlu0 %292  ;;  %v284_v18 = vpop.permute.xlu1 %283  ;;  %v252_v20 = vld [vmem:[#allocation2 + $0x8] sm:$0xf] }
  0xb3   : > { %v1179_v21 = vld [vmem:[#allocation2] sm:$0xff]  ;;  %353 = vrot.lane.b32.xlu0 %v252_v20, %s1025_s11  ;;  %v1186_v23 = vrot.slane %v293_v17, 4  ;;  %v1193_v26 = vrot.slane %v284_v18, 4  ;;  %v307_v36 = vcombine.low %v252_v20, %v252_v20 }
  0xb4   : > { %349 = vrot.lane.b32.xlu1 %v1179_v21, %s1025_s11  ;;  %v306_v34 = vcombine.low %v1179_v21, %v1179_v21  ;;  %v348_v42 = vcombine.high %v1179_v21, %v1179_v21 }
  0xb5   : > { %v1196_v27 = vsel %vm295_vm10, %v1186_v23, %v293_v17  ;;  %v300_v28 = vmul.f32 %v1186_v23, %v252_v20  ;;  %v291_v32 = vmul.f32 %v1193_v26, %v252_v20  ;;  %v1214_v37 = vsel %vm286_vm11, %v1193_v26, %v284_v18 }
  0xb6   : > { %v257_v19 = vpop.permute.xlu0 %256  ;;  %v275_v24 = vpop.permute.xlu1 %274  ;;  %v299_v29 = vmul.f32 %v1196_v27, %v1179_v21  ;;  %v290_v40 = vmul.f32 %v1214_v37, %v1179_v21  ;;  %vm314_vm10 = vcmask 1039360   ;;  %vm426_vm11 = vcmask 293888  }
  0xb7   : > { %v1184_v22 = vrot.slane %v257_v19, 4  ;;  %391 = vrot.lane.b32.xlu0 %v1179_v21, %s1026_s17  ;;  %v1203_v30 = vrot.slane %v275_v24, 4 }
  0xb8   : > { %310 = vrot.lane.b32.xlu1 %v1179_v21, %s1027_s19  ;;  %v402_v44 = vcombine.high %v299_v29, %v299_v29  ;;  %v377_v47 = vcombine.high %v290_v40, %v290_v40 }
  0xb9   : > { %v264_v25 = vmul.f32 %v1184_v22, %v252_v20  ;;  %v282_v35 = vmul.f32 %v1203_v30, %v252_v20  ;;  %v1226_v43 = vsel %vm277_vm12, %v1203_v30, %v275_v24  ;;  %v1240_v49 = vsel %vm259_vm14, %v1184_v22, %v257_v19 }
  0xba   : > { %v266_v31 = vpop.permute.xlu1 %265  ;;  %v281_v45 = vmul.f32 %v1226_v43, %v1179_v21  ;;  %v263_v51 = vmul.f32 %v1240_v49, %v1179_v21 }
  0xbb   : > { %326 = vrot.lane.b32.xlu0 %v264_v25, %s1028_s20  ;;  %v1208_v33 = vrot.slane %v266_v31, 4  ;;  %v363_v38 = vcombine.low %v282_v35, %v282_v35 }
  0xbc   : > { %407 = vrot.lane.b32.xlu1 %v300_v28, %s1029_s22  ;;  %v362_v50 = vcombine.low %v281_v45, %v281_v45  ;;  %v321_v54 = vcombine.high %v263_v51, %v263_v51 }
  0xbd   : > { %v273_v39 = vmul.f32 %v1208_v33, %v252_v20  ;;  %v1233_v46 = vsel %vm268_vm13, %v1208_v33, %v266_v31 }
  0xbe   : > { %v272_v48 = vmul.f32 %v1233_v46, %v1179_v21 }
  0xbf   : > { %403 = vrot.lane.b32.xlu0 %v299_v29, %s1029_s22  ;;  %v336_v41 = vcombine.low %v273_v39, %v273_v39 }
  0xc0   : > { %382 = vrot.lane.b32.xlu1 %v291_v32, %s1030_s26  ;;  %v335_v53 = vcombine.low %v272_v48, %v272_v48 }
  0xc3   : > { %389 = vrot.lane.b32.xlu0 %v306_v34, %s1026_s17 }
  0xc4   : > { %393 = vrot.lane.b32.xlu1 %v307_v36, %s1026_s17 }
  0xc7   : > { %368 = vrot.lane.b32.xlu0 %v363_v38, %s1031_s27  ;;  %v251_v38 = vmul.f32 %v1167_v11, %v1179_v21 }
  0xc8   : > { %378 = vrot.lane.b32.xlu1 %v290_v40, %s1030_s26 }
  0xcb   : > { %341 = vrot.lane.b32.xlu0 %v336_v41, %s1032_s28 }
  0xcc   : > { %351 = vrot.lane.b32.xlu1 %v348_v42, %s1025_s11 }
  0xcf   : > { %405 = vrot.lane.b32.xlu0 %v402_v44, %s1029_s22 }
  0xd0   : > { %366 = vrot.lane.b32.xlu1 %v281_v45, %s1031_s27 }
  0xd3   : > { %380 = vrot.lane.b32.xlu0 %v377_v47, %s1030_s26 }
  0xd4   : > { %339 = vrot.lane.b32.xlu1 %v272_v48, %s1032_s28 }
  0xd7   : > { %364 = vrot.lane.b32.xlu0 %v362_v50, %s1031_s27  ;;  %v302_v50 = vcombine.high %v251_v38, %v251_v38 }
  0xd8   : > { %322 = vrot.lane.b32.xlu1 %v263_v51, %s1028_s20 }
  0xdb   : > { %337 = vrot.lane.b32.xlu0 %v335_v53, %s1032_s28 }
  0xdc   : > { %324 = vrot.lane.b32.xlu1 %v321_v54, %s1028_s20  ;;  %v230_v54 = vld [vmem:[%s1418_s1] sm:$0xf] }
  0xdf   : > { %312 = vrot.lane.b32.xlu0 %v307_v36, %s1027_s19 }
  0xe0   : > { %308 = vrot.lane.b32.xlu1 %v306_v34, %s1027_s19 }
  0xe3   : > { %423 = vperm.xlu0 %915, %v231_v55  }
 0x125   : > { %v354_v56 = vpop.permute.xlu0 %353 }
 0x126   : > { %v350_v57 = vpop.permute.xlu1 %349 }
 0x129   : > { %v392_v58 = vpop.permute.xlu0 %391 }
 0x12a   : > { %v311_v59 = vpop.permute.xlu1 %310 }
 0x12d   : > { %v327_v60 = vpop.permute.xlu0 %326 }
 0x12e   : > { %v408_v61 = vpop.permute.xlu1 %407 }
 0x131   : > { %v404_v62 = vpop.permute.xlu0 %403 }
 0x132   : > { %v383_v63 = vpop.permute.xlu1 %382 }
 0x135   : > { %v390_v0 = vpop.permute.xlu0 %389 }
 0x136   : > { %v394_v1 = vpop.permute.xlu1 %393  ;;  %v396_v12 = vsel %vm395_vm1, %v390_v0, %v392_v58 }
 0x137   : > { %v397_v15 = vsel %vm395_vm1, %v392_v58, %v394_v1 }
 0x139   : > { %v369_v2 = vpop.permute.xlu0 %368 }
 0x13a   : > { %v379_v3 = vpop.permute.xlu1 %378 }
 0x13d   : > { %v342_v4 = vpop.permute.xlu0 %341 }
 0x13e   : > { %v352_v5 = vpop.permute.xlu1 %351 }
 0x13f   : > { %v357_v25 = vsel %vm355_vm4, %v352_v5, %v354_v56  ;;  %v356_v31 = vsel %vm355_vm4, %v350_v57, %v352_v5 }
 0x141   : > { %v406_v7 = vpop.permute.xlu0 %405 }
 0x142   : > { %v367_v8 = vpop.permute.xlu1 %366  ;;  %v411_v9 = vsel %vm409_vm15, %v406_v7, %v408_v61  ;;  %v410_v10 = vsel %vm409_vm15, %v404_v62, %v406_v7 }
 0x143   : > { %838 = vmatprep.subr.msk.mxu0 %vm412_vm0, %v411_v9  ;;  %v372_v16 = vsel %vm370_vm2, %v367_v8, %v369_v2 }
 0x144   : > { %839 = vmatpush1.msk.msra.mxu0 %vm412_vm0, %v410_v10  ;;  %v418_v29 = vsel %vm412_vm0, %v357_v25, %v372_v16 }
 0x145   : > { %v381_v13 = vpop.permute.xlu0 %380 }
 0x146   : > { %v385_v17 = vsel %vm384_vm3, %v379_v3, %v381_v13  ;;  %v386_v18 = vsel %vm384_vm3, %v381_v13, %v383_v63  ;;  %v340_v19 = vpop.permute.xlu1 %339 }
 0x147   : > { %v420_v20 = vsel %vm412_vm0, %v386_v18, %v397_v15  ;;  %v419_v24 = vsel %vm412_vm0, %v385_v17, %v396_v12  ;;  %v345_v41 = vsel %vm343_vm5, %v340_v19, %v342_v4 }
 0x148   : > { %458 = vmatprep.subr.mxu0 %v420_v20 }
 0x149   : > { %459 = vmatpush1.msra.mxu0 %v419_v24  ;;  %v365_v28 = vpop.permute.xlu0 %364 }
 0x14a   : > { %v371_v32 = vsel %vm370_vm2, %v365_v28, %v367_v8  ;;  %460 = vmatprep.subr.mxu0 %v418_v29  ;;  %v323_v34 = vpop.permute.xlu1 %322 }
 0x14b   : > { %v417_v35 = vsel %vm412_vm0, %v356_v31, %v371_v32 }
 0x14c   : > { %461 = vmatpush1.msra.mxu0 %v417_v35 }
 0x14d   : > { %v338_v36 = vpop.permute.xlu0 %337 }
 0x14e   : > { %v344_v39 = vsel %vm343_vm5, %v338_v36, %v340_v19  ;;  %v325_v40 = vpop.permute.xlu1 %324 }
 0x14f   : > { %v329_v42 = vsel %vm328_vm6, %v323_v34, %v325_v40  ;;  %v330_v44 = vsel %vm328_vm6, %v325_v40, %v327_v60 }
 0x150   : > { %v416_v45 = vsel %vm412_vm0, %v330_v44, %v345_v41  ;;  %v415_v47 = vsel %vm412_vm0, %v329_v42, %v344_v39 }
 0x151   : > { %v313_v48 = vpop.permute.xlu0 %312  ;;  %462 = vmatprep.subr.mxu0 %v416_v45 }
 0x152   : > { %v316_v51 = vsel %vm314_vm10, %v311_v59, %v313_v48  ;;  %463 = vmatpush1.msra.mxu0 %v415_v47  ;;  %v309_v21 = vpop.permute.xlu1 %308 }
 0x153   : > { %v315_v52 = vsel %vm314_vm10, %v309_v21, %v311_v59  ;;  %v414_v53 = vsel %vm412_vm0, %v302_v50, %v316_v51 }
 0x154   : > { %464 = vmatprep.subr.mxu0 %v414_v53  ;;  %v413_v55 = vsel %vm412_vm0, %v251_v38, %v315_v52 }
 0x155   : > { %465 = vmatpush1.msra.mxu0 %v413_v55 }
 0x156   : > { %840 = vmatmul.mubr.msk.f32.vlgmr.msra.gmra.mxu0 %vm426_vm11, %v230_v54 }
 0x15e   : > { %v424_v56 = vpop.permute.xlu0 %423 }
 0x216   : > { %v500_v57 = vpop.f32.mrf.mxu0 }
 0x217   : > { %v501_v58 = vadd.f32 %v500_v57, %v424_v56 }
 0x218   : > { %v502_v60 = vpop.f32.mrf.mxu0 }
 0x219   : > { %v503_v61 = vadd.f32 %v502_v60, %v424_v56  ;;  %v505_v62 = vmax.f32 %v501_v58, 0.0 }
 0x21b   : > { %v506_v59 = vmax.f32 %v503_v61, 0.0 }
 0x21d   : > { %v509_v63 = vcombine.low %v505_v62, %v506_v59 }
 0x21f   : > { %v1288_v0 = vadd.f32 %v509_v63, %v1163_v6 }
 0x221   : > { %517 = vrot.lane.b32.xlu1 %v1288_v0, %s1019_s4 }
 0x293   : > { %v518_v1 = vpop.permute.xlu1 %517 }
 0x294   : > { %v519_v2 = vrot.slane %v518_v1, 4 }
 0x296   : > { %v520_v3 = vsel %vm236_vm7, %v519_v2, %v518_v1  ;;  %524 = vst.msk [vmem:[#allocation2 + $0x8] sm:$0xf] %vm244_vm8, %v519_v2 }
 0x297   : > { %523 = vst.msk [vmem:[#allocation2] sm:$0xff] %vm1171_vm9, %v520_v3 }
 0x29d   : > { %v527_v4 = vld [vmem:[#allocation2 + $0x8] sm:$0xf] }
 0x29e   : > { %587 = vrot.lane.b32.xlu1 %v527_v4, %s1025_s11  ;;  %v1297_v5 = vld [vmem:[#allocation2] sm:$0xff]  ;;  %v529_v6 = vmul.f32 %v527_v4, %v1184_v22  ;;  %v537_v7 = vmul.f32 %v527_v4, %v1186_v23  ;;  %v535_v8 = vmul.f32 %v527_v4, %v1193_v26  ;;  %v533_v22 = vmul.f32 %v527_v4, %v1203_v30 }
 0x29f   : > { %583 = vrot.lane.b32.xlu0 %v1297_v5, %s1025_s11  ;;  %v536_v14 = vmul.f32 %v1297_v5, %v1196_v27  ;;  %v543_v9 = vcombine.low %v1297_v5, %v1297_v5  ;;  %v544_v10 = vcombine.low %v527_v4, %v527_v4  ;;  %v531_v12 = vmul.f32 %v527_v4, %v1208_v33 }
 0x2a0   : > { %v596_v23 = vcombine.low %v533_v22, %v533_v22  ;;  %v534_v26 = vmul.f32 %v1297_v5, %v1214_v37  ;;  %v582_v13 = vcombine.high %v1297_v5, %v1297_v5  ;;  %v532_v15 = vmul.f32 %v1297_v5, %v1226_v43 }
 0x2a1   : > { %v571_v27 = vcombine.low %v531_v12, %v531_v12  ;;  %v632_v30 = vcombine.high %v536_v14, %v536_v14  ;;  %v530_v37 = vmul.f32 %v1297_v5, %v1233_v46  ;;  %v528_v17 = vmul.f32 %v1297_v5, %v1240_v49  ;;  %v842_v46 = vld [vmem:[%s1419_s2 + $0x4] sm:$0xf] }
 0x2a2   : > { %622 = vrot.lane.b32.xlu1 %v1297_v5, %s1026_s17  ;;  %v609_v33 = vcombine.high %v534_v26, %v534_v26  ;;  %v595_v16 = vcombine.low %v532_v15, %v532_v15  ;;  %v526_v63 = vmul.f32 %v1297_v5, %v1167_v11 }
 0x2a3   : > { %547 = vrot.lane.b32.xlu0 %v1297_v5, %s1027_s19  ;;  %v570_v43 = vcombine.low %v530_v37, %v530_v37  ;;  %v557_v18 = vcombine.high %v528_v17, %v528_v17 }
 0x2a6   : > { %562 = vrot.lane.b32.xlu1 %v529_v6, %s1028_s20 }
 0x2a7   : > { %637 = vrot.lane.b32.xlu0 %v537_v7, %s1029_s22 }
 0x2aa   : > { %633 = vrot.lane.b32.xlu1 %v536_v14, %s1029_s22 }
 0x2ab   : > { %614 = vrot.lane.b32.xlu0 %v535_v8, %s1030_s26 }
 0x2ae   : > { %620 = vrot.lane.b32.xlu1 %v543_v9, %s1026_s17 }
 0x2af   : > { %624 = vrot.lane.b32.xlu0 %v544_v10, %s1026_s17  ;;  %s186_s17 = scalar_lea.vmem [#allocation6], %s832_s30 }
 0x2b2   : > { %601 = vrot.lane.b32.xlu1 %v596_v23, %s1031_s27  ;;  %v841_v23 = vld [vmem:[%s1418_s1 + $0x4] sm:$0xf] }
 0x2b3   : > { %610 = vrot.lane.b32.xlu0 %v534_v26, %s1030_s26 }
 0x2b6   : > { %576 = vrot.lane.b32.xlu1 %v571_v27, %s1032_s28 }
 0x2b7   : > { %585 = vrot.lane.b32.xlu0 %v582_v13, %s1025_s11  ;;  %s852_s11 = sshll.u32 %s1076_s16, 7  ;;  %s955_s16 = sshll.u32 %s1034_s5, 4  ;;  %s956_s16 = int_to_ptr.vmem [resolvable:$false] %s955_s16 }
 0x2b8   : > { %s957_s30 = scalar_lea.vmem %s956_s16, 256 }
 0x2ba   : > { %635 = vrot.lane.b32.xlu1 %v632_v30, %s1029_s22 }
 0x2bb   : > { %599 = vrot.lane.b32.xlu0 %v532_v15, %s1031_s27 }
 0x2be   : > { %612 = vrot.lane.b32.xlu1 %v609_v33, %s1030_s26  ;;  %s753_s26 = scalar_lea.hbm %s1420_s3, %s852_s11 }
 0x2bf   : > { %574 = vrot.lane.b32.xlu0 %v530_v37, %s1032_s28 }
 0x2c2   : > { %597 = vrot.lane.b32.xlu1 %v595_v16, %s1031_s27  ;;  %s741_s27 = scalar_lea.sflag [#allocation5], %s1153_s29 }
 0x2c3   : > { %558 = vrot.lane.b32.xlu0 %v528_v17, %s1028_s20 }
 0x2c6   : > { %572 = vrot.lane.b32.xlu1 %v570_v43, %s1032_s28 }
 0x2c7   : > { %560 = vrot.lane.b32.xlu0 %v557_v18, %s1028_s20 }
 0x2ca   : > { %549 = vrot.lane.b32.xlu1 %v544_v10, %s1027_s19 }
 0x2cb   : > { %545 = vrot.lane.b32.xlu0 %v543_v9, %s1027_s19  ;;  %v539_v9 = vcombine.high %v526_v63, %v526_v63  ;;  %s755_s19 = sshll.u32 %s186_s17, 4  ;;  %s756_s19 = int_to_ptr.vmem [resolvable:$true] %s755_s19 }
 0x2cc   : > { %s951_s28 = scalar_lea.vmem %s756_s19, 128  ;;  %p958_p3 = scmp.lt.s32.totalorder %s756_s19, %s956_s16 }
 0x2cd   : > { %p952_p11 = scmp.ne.s32.totalorder %s756_s19, %s951_s28  ;;  %p959_p5 = scmp.lt.s32.totalorder %s957_s30, %s951_s28 }
 0x2ce   : > { %651 = vperm.xlu1 %916, %v842_v46  }
 0x2cf   : > { %p953_p13 = pnand %p952_p11, %p1433_p12  ;;  %p960_p8 = por %p959_p5, %p958_p3 }
 0x2d1   : > { %p954_p1 = pneg %p953_p13 }
 0x2d3   : > { %p961_p10 = pnand %p960_p8, %p954_p1 }
 0x310   : > { %v588_v49 = vpop.permute.xlu1 %587 }
 0x311   : > { %v584_v19 = vpop.permute.xlu0 %583 }
 0x314   : > { %v623_v20 = vpop.permute.xlu1 %622 }
 0x315   : > { %v548_v24 = vpop.permute.xlu0 %547 }
 0x318   : > { %v563_v25 = vpop.permute.xlu1 %562 }
 0x319   : > { %v638_v28 = vpop.permute.xlu0 %637 }
 0x31c   : > { %v634_v29 = vpop.permute.xlu1 %633 }
 0x31d   : > { %v615_v31 = vpop.permute.xlu0 %614 }
 0x320   : > { %v621_v32 = vpop.permute.xlu1 %620 }
 0x321   : > { %v625_v34 = vpop.permute.xlu0 %624  ;;  %v626_v45 = vsel %vm395_vm1, %v621_v32, %v623_v20 }
 0x322   : > { %v627_v48 = vsel %vm395_vm1, %v623_v20, %v625_v34 }
 0x324   : > { %v602_v35 = vpop.permute.xlu1 %601 }
 0x325   : > { %v611_v36 = vpop.permute.xlu0 %610 }
 0x328   : > { %v577_v38 = vpop.permute.xlu1 %576 }
 0x329   : > { %v586_v39 = vpop.permute.xlu0 %585 }
 0x32a   : > { %v590_v55 = vsel %vm355_vm4, %v586_v39, %v588_v49  ;;  %v589_v58 = vsel %vm355_vm4, %v584_v19, %v586_v39 }
 0x32c   : > { %v636_v40 = vpop.permute.xlu1 %635 }
 0x32d   : > { %v600_v41 = vpop.permute.xlu0 %599  ;;  %v640_v42 = vsel %vm409_vm15, %v636_v40, %v638_v28  ;;  %v639_v44 = vsel %vm409_vm15, %v634_v29, %v636_v40 }
 0x32e   : > { %843 = vmatprep.subr.msk.mxu1 %vm412_vm0, %v640_v42  ;;  %v604_v50 = vsel %vm370_vm2, %v600_v41, %v602_v35 }
 0x32f   : > { %844 = vmatpush1.msk.msra.mxu1 %vm412_vm0, %v639_v44  ;;  %v646_v57 = vsel %vm412_vm0, %v590_v55, %v604_v50 }
 0x330   : > { %v613_v47 = vpop.permute.xlu1 %612 }
 0x331   : > { %v616_v51 = vsel %vm384_vm3, %v611_v36, %v613_v47  ;;  %v617_v21 = vsel %vm384_vm3, %v613_v47, %v615_v31  ;;  %v575_v52 = vpop.permute.xlu0 %574 }
 0x332   : > { %v648_v53 = vsel %vm412_vm0, %v617_v21, %v627_v48  ;;  %v647_v54 = vsel %vm412_vm0, %v616_v51, %v626_v45  ;;  %v579_v3 = vsel %vm343_vm5, %v575_v52, %v577_v38 }
 0x333   : > { %685 = vmatprep.subr.mxu1 %v648_v53 }
 0x334   : > { %686 = vmatpush1.msra.mxu1 %v647_v54  ;;  %v598_v56 = vpop.permute.xlu1 %597 }
 0x335   : > { %v603_v60 = vsel %vm370_vm2, %v598_v56, %v600_v41  ;;  %687 = vmatprep.subr.mxu1 %v646_v57  ;;  %v559_v61 = vpop.permute.xlu0 %558 }
 0x336   : > { %v645_v62 = vsel %vm412_vm0, %v589_v58, %v603_v60 }
 0x337   : > { %688 = vmatpush1.msra.mxu1 %v645_v62 }
 0x338   : > { %v573_v59 = vpop.permute.xlu1 %572 }
 0x339   : > { %v578_v1 = vsel %vm343_vm5, %v573_v59, %v575_v52  ;;  %v561_v2 = vpop.permute.xlu0 %560 }
 0x33a   : > { %v564_v4 = vsel %vm328_vm6, %v559_v61, %v561_v2  ;;  %v565_v6 = vsel %vm328_vm6, %v561_v2, %v563_v25 }
 0x33b   : > { %v644_v7 = vsel %vm412_vm0, %v565_v6, %v579_v3  ;;  %v643_v14 = vsel %vm412_vm0, %v564_v4, %v578_v1 }
 0x33c   : > { %v550_v8 = vpop.permute.xlu1 %549  ;;  %689 = vmatprep.subr.mxu1 %v644_v7 }
 0x33d   : > { %v552_v22 = vsel %vm314_vm10, %v548_v24, %v550_v8  ;;  %690 = vmatpush1.msra.mxu1 %v643_v14  ;;  %v546_v11 = vpop.permute.xlu0 %545 }
 0x33e   : > { %v551_v5 = vsel %vm314_vm10, %v546_v11, %v548_v24  ;;  %v642_v10 = vsel %vm412_vm0, %v539_v9, %v552_v22 }
 0x33f   : > { %691 = vmatprep.subr.mxu1 %v642_v10  ;;  %v641_v12 = vsel %vm412_vm0, %v526_v63, %v551_v5 }
 0x340   : > { %692 = vmatpush1.msra.mxu1 %v641_v12 }
 0x341   : > { %845 = vmatmul.mubr.msk.f32.vlgmr.msra.gmra.mxu1 %vm426_vm11, %v841_v23 }
 0x349   : > { %v652_v26 = vpop.permute.xlu1 %651 }
 0x401   : > { %v727_v27 = vpop.f32.mrf.mxu1 }
 0x402   : > { %v728_v13 = vadd.f32 %v727_v27, %v652_v26 }
 0x403   : > { %v729_v30 = vpop.f32.mrf.mxu1 }
 0x404   : > { %v730_v15 = vadd.f32 %v729_v30, %v652_v26  ;;  %v732_v33 = vmax.f32 %v728_v13, 0.0 }
 0x406   : > { %v733_v37 = vmax.f32 %v730_v15, 0.0 }
 0x408   : > { %v736_v16 = vcombine.low %v732_v33, %v733_v37 }
 0x40a   : > { %v738_v17 = vadd.f32 %v736_v16, %v1288_v0 }
 0x40c   : > { %739 = vst [vmem:[%s186_s17] sm:$0xff] %v738_v17 }
 0x40d   : > { %964 = shalt.err (!%p961_p10)
}
 0x40e   : > { %s965_s7 = scalar_lea.hbm %s753_s26, 128  ;;  %s969_s6 = scalar_lea.hbm %s1420_s3, 256 }
 0x40f   : > { %p966_p2 = scmp.ne.s32.totalorder %s753_s26, %s965_s7  ;;  %p970_p7 = scmp.lt.s32.totalorder %s753_s26, %s1420_s3 }
 0x410   : > { %p971_p0 = scmp.lt.s32.totalorder %s969_s6, %s965_s7 }
 0x411   : > { %p967_p4 = pnand %p966_p2, %p1433_p12 }
 0x412   : > { %p972_p6 = por %p971_p0, %p970_p7 }
 0x413   : > { %p968_p9 = pneg %p967_p4 }
 0x415   : > { %p973_p11 = pnand %p972_p6, %p968_p9 }
 0x417   : > { %976 = shalt.err (!%p973_p11)
}
 0x418   : > { %855 = dma.vmem_to_hbm [thread:$0]  (%p1433_p12), %s756_s19, 128, %s753_s26, %s741_s27  }
 0x419 PF: > { %s767_s9 = sand.u32 1, %s1003_s12   ;;  %p1434_p13 = scmp.ne.s32.totalorder %s1426_s25, 0 }
 0x41a   : > { %p1435_p1 = scmp.ge.s32.totalorder %s1015_s15, 2  ;;  %s768_s10 = scalar_lea.sflag [#allocation5], %s767_s9 }
 0x41c   : > { %p862_p3 = pnand %p1435_p1, %p1434_p13 }
 0x41e   : > { %p863_p5 = pneg %p862_p3 }
 0x420   : > { %998 = dma.done.wait (%p863_p5), %s768_s10, 128  }
 0x421   : > { %1000 = vsyncadd (%p863_p5), %s768_s10, 4294967168  ;;  %p16_p8 = scmp.ge.s32.totalorder %s1080_s18, 4   ;;  %s1436_s12 = smov %s1007_s13 }
 0x422   : > { %s1437_s13 = smov %s1011_s14  ;;  %s1438_s14 = smov %s1092_s21 }
 0x423   : > { %s1439_s15 = smov %s1080_s18  ;;  %18 = sbr.rel (!%p16_p8) target bundleno = 5 (0x5), region = 79 }
 0x428   :  { %773 = vsyncpa [#allocation4], 1 }
 0x429   :  { %775 = vsyncpa [#allocation4 + $0x1], 1 }
 0x42a   :  { %776 = vsyncpa [#allocation5], 1 }
 0x42b   :  { %778 = vsyncpa [#allocation5 + $0x1], 1 }

</bundles_post_ra>
